<compile_context>
chip_gen: v7x
topology: tpu7x:2x2x1
jax: 0.10.0
libtpu: 0.0.40
codegen_flags: <defaults>
</compile_context>

<pallas_src>
import jax
import jax.numpy as jnp
from jax.experimental import pallas as pl
from jax.experimental.pallas import tpu as pltpu


def _round_up(v, m):
    return (v + m - 1) // m * m


def _device_info():
    """(two_tensorcores_per_chip, has_bf16_vpu) — conservative defaults."""
    kind = ""
    try:
        kind = jax.devices()[0].device_kind.lower()
    except Exception:
        pass
    two_cores = "7" in kind                                   # v7x: 2 TCs/chip
    bf16_vpu = bool(kind) and not any(s in kind for s in ("v2", "v3", "v4", "v5"))
    return two_cores, bf16_vpu


def _make_kernel(n_rows, compute_dtype):
    """Kernel over one (N, lanes) block; channel index == pl.program_id(0)."""
    cd = compute_dtype

    def kernel(p_ref, x_ref, o_ref):
        # p_ref: (6, C) folded conv+BN coefficients in SMEM (scalar prefetch).
        #   rows 0..2: d=1 branch (a1, b1, c1); rows 3..5: d=2 branch.
        c = pl.program_id(0)
        a1 = p_ref[0, c].astype(cd)
        b1 = p_ref[1, c].astype(cd)
        c1 = p_ref[2, c].astype(cd)
        a2 = p_ref[3, c].astype(cd)
        b2 = p_ref[4, c].astype(cd)
        c2 = p_ref[5, c].astype(cd)

        x = x_ref[...].astype(cd)                            # (N, lanes)
        # Neighbour rows via XLU sublane rotations (co-issue with VPU work).
        x_prev = pltpu.roll(x, shift=1, axis=0)              # x_prev[i] = x[i-1]
        x_next = pltpu.roll(x, shift=n_rows - 1, axis=0)     # x_next[i] = x[i+1]

        # Bulk result (correct for interior rows; rows 0 / n-1 fixed below).
        out1 = jnp.maximum(a1 * x_prev + b1 * x + c1, 0.0)        # d=1 + resize
        out2 = jnp.maximum(a2 * x_prev + b2 * x_next + c2, 0.0)   # d=2, zero pad
        o_ref[...] = (0.5 * (out1 + out2) + x).astype(o_ref.dtype)

        # Row 0: d=1 nearest-resize duplicates y1[0] = a1*x[0] + b1*x[1];
        #        d=2 left zero pad drops the a2 term.
        x0 = x[0:1, :]
        x1 = x[1:2, :]
        r0 = 0.5 * (jnp.maximum(a1 * x0 + b1 * x1 + c1, 0.0)
                    + jnp.maximum(b2 * x1 + c2, 0.0)) + x0
        o_ref[0:1, :] = r0.astype(o_ref.dtype)

        # Row n-1: d=1 unchanged; d=2 right zero pad drops the b2 term.
        xm = x[n_rows - 2:n_rows - 1, :]
        xl = x[n_rows - 1:n_rows, :]
        rl = 0.5 * (jnp.maximum(a1 * xm + b1 * xl + c1, 0.0)
                    + jnp.maximum(a2 * xm + c2, 0.0)) + xl
        o_ref[n_rows - 1:n_rows, :] = rl.astype(o_ref.dtype)

    return kernel


def ms_tconv_short(x, params, *, interpret=False):
    """x: (B, C, N, T) activations; params: (6, C) folded conv+BN coefficients."""
    B, C, N, T = x.shape
    if N < 2:
        raise ValueError("N (conv axis) must be >= 2")
    itemsize = jnp.dtype(x.dtype).itemsize
    two_cores, bf16_vpu = _device_info()
    # bf16 VPU math on v6e/v7x; fp32 elsewhere (v5e has no bf16 VALU).
    compute_dtype = x.dtype if (x.dtype == jnp.bfloat16 and bf16_vpu) else jnp.float32

    params = params.astype(jnp.float32)          # compact (6, C) SMEM table

    # Largest lane extent whose in+out blocks (double buffered, real itemsize)
    # stay within ~12 MiB of VMEM.
    lane_cap = (12 << 20) // (4 * N * itemsize)
    lane_cap = max(128, min(32768, lane_cap // 128 * 128))

    kernel = _make_kernel(N, compute_dtype)
    total = B * C * N * T
    flops = 13 * total

    if T % 128 == 0:
        # ---- Path A: no relayout — kernel reads x in its native layout. ----
        if T <= lane_cap:
            tile_t = T
        else:
            tile_t = lane_cap
            while T % tile_t:
                tile_t -= 128
        grid = (C, B, T // tile_t)
        spec = pl.BlockSpec((pl.Squeezed(), pl.Squeezed(), N, tile_t),
                            lambda c, b, t, p: (b, c, 0, t))
        vmem_limit = int(min(30 << 20, max(16 << 20, 6 * N * tile_t * itemsize)))
        return pl.pallas_call(
            kernel,
            out_shape=jax.ShapeDtypeStruct((B, C, N, T), x.dtype),
            grid_spec=pltpu.PrefetchScalarGridSpec(
                num_scalar_prefetch=1, grid=grid,
                in_specs=[spec], out_specs=spec),
            compiler_params=pltpu.CompilerParams(
                dimension_semantics=("parallel", "parallel", "parallel"),
                vmem_limit_bytes=vmem_limit),
            cost_estimate=pl.CostEstimate(
                flops=flops, transcendentals=0,
                bytes_accessed=2 * total * itemsize + 24 * C),
            interpret=interpret,
        )(params, x)

    # ---- Path B: lane-dense relayout (C, N, B*T); channel is a grid axis. ----
    L = B * T
    xr = jnp.transpose(x, (1, 2, 0, 3)).reshape(C, N, L)
    if L <= lane_cap:
        lane_tile = L                           # full extent: no 128-pad needed
        if two_cores and C % 2 == 1 and L % 256 == 0:
            lane_tile = L // 2                  # keep both v7x TensorCores busy
    else:
        lane_tile = lane_cap
    L_pad = _round_up(L, lane_tile)
    if L_pad != L:
        xr = jnp.pad(xr, ((0, 0), (0, 0), (0, L_pad - L)))
    grid = (C, L_pad // lane_tile)
    spec = pl.BlockSpec((pl.Squeezed(), N, lane_tile),
                        lambda c, j, p: (c, 0, j))
    vmem_limit = int(min(30 << 20, max(16 << 20, 6 * N * lane_tile * itemsize)))
    out_r = pl.pallas_call(
        kernel,
        out_shape=jax.ShapeDtypeStruct((C, N, L_pad), x.dtype),
        grid_spec=pltpu.PrefetchScalarGridSpec(
            num_scalar_prefetch=1, grid=grid,
            in_specs=[spec], out_specs=spec),
        compiler_params=pltpu.CompilerParams(
            dimension_semantics=("parallel", "parallel"),
            vmem_limit_bytes=vmem_limit,
            # Let XLA fuse the producing transpose into the operand read.
            allow_input_fusion=[False, True]),
        cost_estimate=pl.CostEstimate(
            flops=flops, transcendentals=0,
            bytes_accessed=2 * C * N * L_pad * itemsize + 24 * C),
        interpret=interpret,
    )(params, xr)
    return out_r[:, :, :L].reshape(C, N, B, T).transpose(2, 0, 1, 3)


def init_folded_params(key, C, dilations=(1, 2), eps=1e-5):
    """Deterministic synthetic Conv2d + BatchNorm2d (eval) params, folded per channel."""
    rows = []
    for i, _d in enumerate(dilations):
        k = jax.random.fold_in(key, i)
        kw, kb, kg, kbe, km, kv = jax.random.split(k, 6)
        w = 0.5 * jax.random.normal(kw, (C, 1, 2, 1), jnp.float32)     # conv weight
        bias = 0.1 * jax.random.normal(kb, (C,), jnp.float32)          # conv bias
        gamma = 1.0 + 0.1 * jax.random.normal(kg, (C,), jnp.float32)   # BN weight
        beta = 0.1 * jax.random.normal(kbe, (C,), jnp.float32)         # BN bias
        mean = 0.1 * jax.random.normal(km, (C,), jnp.float32)          # BN running_mean
        var = jnp.abs(jax.random.normal(kv, (C,), jnp.float32)) + 0.5  # BN running_var
        scale = gamma / jnp.sqrt(var + eps)
        rows.append(scale * w[:, 0, 0, 0])
        rows.append(scale * w[:, 0, 1, 0])
        rows.append(scale * (bias - mean) + beta)
    return jnp.stack(rows, axis=0)  # (6, C)


def reference(x, params):
    """Pure-JAX reference of the same (inference-mode) forward."""
    p = [params[i][None, :, None, None] for i in range(6)]
    y1 = jnp.maximum(p[0] * x[:, :, :-1, :] + p[1] * x[:, :, 1:, :] + p[2], 0.0)
    out1 = jnp.concatenate([y1[:, :, :1, :], y1], axis=2)   # nearest resize back to n
    xp = jnp.pad(x, ((0, 0), (0, 0), (1, 1), (0, 0)))
    y2 = jnp.maximum(p[3] * xp[:, :, :-2, :] + p[4] * xp[:, :, 2:, :] + p[5], 0.0)
    return 0.5 * (out1 + y2) + x


if __name__ == "__main__":
    key = jax.random.PRNGKey(0)
    kx, kp, kx2 = jax.random.split(key, 3)

    fwd = jax.jit(ms_tconv_short)

    # Small test hitting Path B (T=16 is not a multiple of 128).
    B, C, N, T = 2, 4, 16, 16
    x = jax.random.normal(kx, (B, C, N, T), jnp.float32)
    params = init_folded_params(kp, C)
    out = jax.block_until_ready(fwd(x, params))
    ref = reference(x, params)
    assert out.shape == (B, C, N, T)
    assert jnp.allclose(out, ref, atol=1e-5, rtol=1e-5), (
        float(jnp.max(jnp.abs(out - ref))))

    # Second test hitting Path A (T=128: direct, relayout-free path).
    x2 = jax.random.normal(kx2, (2, 4, 16, 128), jnp.float32)
    out2 = jax.block_until_ready(fwd(x2, params))
    ref2 = reference(x2, params)
    assert jnp.allclose(out2, ref2, atol=1e-5, rtol=1e-5), (
        float(jnp.max(jnp.abs(out2 - ref2))))

    print("KERNEL_OK")
</pallas_src>

<mosaic_0001>
module attributes {stable_mosaic.version = 11 : i64} {
  func.func @kernel(%arg0: i32, %arg1: i32, %arg2: memref<6x4xf32, #tpu.memory_space<smem>>, %arg3: memref<1x16x32xf32, #tpu.memory_space<vmem>>, %arg4: memref<1x16x32xf32, #tpu.memory_space<vmem>>) attributes {dimension_semantics = [#tpu.dimension_semantics<parallel>, #tpu.dimension_semantics<parallel>], iteration_bounds = array<i64: 4, 1>, scalar_prefetch = 1 : i64, scratch_operands = 0 : i64, tpu.core_type = #tpu.core_type<tc>, window_params = [{transform_indices = @transform_0, window_bounds = array<i64: 1, 16, 32>}, {transform_indices = @transform_1, window_bounds = array<i64: 1, 16, 32>}]} {
    %c0 = arith.constant 0 : index
    %0 = arith.index_cast %arg0 : i32 to index
    %1 = memref.load %arg2[%c0, %0] : memref<6x4xf32, #tpu.memory_space<smem>>
    %c1 = arith.constant 1 : index
    %2 = arith.index_cast %arg0 : i32 to index
    %3 = memref.load %arg2[%c1, %2] : memref<6x4xf32, #tpu.memory_space<smem>>
    %c2 = arith.constant 2 : index
    %4 = arith.index_cast %arg0 : i32 to index
    %5 = memref.load %arg2[%c2, %4] : memref<6x4xf32, #tpu.memory_space<smem>>
    %c3 = arith.constant 3 : index
    %6 = arith.index_cast %arg0 : i32 to index
    %7 = memref.load %arg2[%c3, %6] : memref<6x4xf32, #tpu.memory_space<smem>>
    %c4 = arith.constant 4 : index
    %8 = arith.index_cast %arg0 : i32 to index
    %9 = memref.load %arg2[%c4, %8] : memref<6x4xf32, #tpu.memory_space<smem>>
    %c5 = arith.constant 5 : index
    %10 = arith.index_cast %arg0 : i32 to index
    %11 = memref.load %arg2[%c5, %10] : memref<6x4xf32, #tpu.memory_space<smem>>
    %c0_0 = arith.constant 0 : index
    %c0_1 = arith.constant 0 : index
    %c0_2 = arith.constant 0 : index
    %12 = vector.load %arg3[%c0_0, %c0_1, %c0_2] : memref<1x16x32xf32, #tpu.memory_space<vmem>>, vector<1x16x32xf32>
    %13 = vector.shape_cast %12 : vector<1x16x32xf32> to vector<16x32xf32>
    %c1_i32 = arith.constant 1 : i32
    %14 = tpu.dynamic_rotate %13 by %c1_i32 dim 0 : vector<16x32xf32>, i32 -> vector<16x32xf32>
    %c15_i32 = arith.constant 15 : i32
    %15 = tpu.dynamic_rotate %13 by %c15_i32 dim 0 : vector<16x32xf32>, i32 -> vector<16x32xf32>
    %16 = vector.broadcast %1 : f32 to vector<16x32xf32>
    %17 = arith.mulf %16, %14 : vector<16x32xf32>
    %18 = vector.broadcast %3 : f32 to vector<16x32xf32>
    %19 = arith.mulf %18, %13 : vector<16x32xf32>
    %20 = arith.addf %17, %19 : vector<16x32xf32>
    %21 = vector.broadcast %5 : f32 to vector<16x32xf32>
    %22 = arith.addf %20, %21 : vector<16x32xf32>
    %cst = arith.constant 0.000000e+00 : f32
    %23 = vector.broadcast %cst : f32 to vector<16x32xf32>
    %24 = arith.maximumf %22, %23 : vector<16x32xf32>
    %25 = vector.broadcast %7 : f32 to vector<16x32xf32>
    %26 = arith.mulf %25, %14 : vector<16x32xf32>
    %27 = vector.broadcast %9 : f32 to vector<16x32xf32>
    %28 = arith.mulf %27, %15 : vector<16x32xf32>
    %29 = arith.addf %26, %28 : vector<16x32xf32>
    %30 = vector.broadcast %11 : f32 to vector<16x32xf32>
    %31 = arith.addf %29, %30 : vector<16x32xf32>
    %cst_3 = arith.constant 0.000000e+00 : f32
    %32 = vector.broadcast %cst_3 : f32 to vector<16x32xf32>
    %33 = arith.maximumf %31, %32 : vector<16x32xf32>
    %34 = arith.addf %24, %33 : vector<16x32xf32>
    %cst_4 = arith.constant 5.000000e-01 : f32
    %35 = vector.broadcast %cst_4 : f32 to vector<16x32xf32>
    %36 = arith.mulf %35, %34 : vector<16x32xf32>
    %37 = arith.addf %36, %13 : vector<16x32xf32>
    %c0_5 = arith.constant 0 : index
    %c0_6 = arith.constant 0 : index
    %c0_7 = arith.constant 0 : index
    %38 = vector.load %arg4[%c0_5, %c0_6, %c0_7] : memref<1x16x32xf32, #tpu.memory_space<vmem>>, vector<1x16x32xf32>
    %39 = vector.shape_cast %38 : vector<1x16x32xf32> to vector<16x32xf32>
    %40 = vector.shape_cast %37 : vector<16x32xf32> to vector<1x16x32xf32>
    tpu.vector_store %arg4[%c0_5, %c0_6, %c0_7], %40 {strides = array<i32>} : memref<1x16x32xf32, #tpu.memory_space<vmem>>, vector<1x16x32xf32>,
    %41 = vector.extract_strided_slice %13 {offsets = [0, 0], sizes = [1, 32], strides = [1, 1]} : vector<16x32xf32> to vector<1x32xf32>
    %42 = vector.extract_strided_slice %13 {offsets = [1, 0], sizes = [1, 32], strides = [1, 1]} : vector<16x32xf32> to vector<1x32xf32>
    %43 = vector.broadcast %1 : f32 to vector<1x32xf32>
    %44 = arith.mulf %43, %41 : vector<1x32xf32>
    %45 = vector.broadcast %3 : f32 to vector<1x32xf32>
    %46 = arith.mulf %45, %42 : vector<1x32xf32>
    %47 = arith.addf %44, %46 : vector<1x32xf32>
    %48 = vector.broadcast %5 : f32 to vector<1x32xf32>
    %49 = arith.addf %47, %48 : vector<1x32xf32>
    %cst_8 = arith.constant 0.000000e+00 : f32
    %50 = vector.broadcast %cst_8 : f32 to vector<1x32xf32>
    %51 = arith.maximumf %49, %50 : vector<1x32xf32>
    %52 = vector.broadcast %9 : f32 to vector<1x32xf32>
    %53 = arith.mulf %52, %42 : vector<1x32xf32>
    %54 = vector.broadcast %11 : f32 to vector<1x32xf32>
    %55 = arith.addf %53, %54 : vector<1x32xf32>
    %cst_9 = arith.constant 0.000000e+00 : f32
    %56 = vector.broadcast %cst_9 : f32 to vector<1x32xf32>
    %57 = arith.maximumf %55, %56 : vector<1x32xf32>
    %58 = arith.addf %51, %57 : vector<1x32xf32>
    %cst_10 = arith.constant 5.000000e-01 : f32
    %59 = vector.broadcast %cst_10 : f32 to vector<1x32xf32>
    %60 = arith.mulf %59, %58 : vector<1x32xf32>
    %61 = arith.addf %60, %41 : vector<1x32xf32>
    %c0_11 = arith.constant 0 : index
    %c0_12 = arith.constant 0 : index
    %c0_13 = arith.constant 0 : index
    %62 = vector.load %arg4[%c0_11, %c0_12, %c0_13] : memref<1x16x32xf32, #tpu.memory_space<vmem>>, vector<1x1x32xf32>
    %63 = vector.shape_cast %62 : vector<1x1x32xf32> to vector<1x32xf32>
    %64 = vector.shape_cast %61 : vector<1x32xf32> to vector<1x1x32xf32>
    tpu.vector_store %arg4[%c0_11, %c0_12, %c0_13], %64 {strides = array<i32>} : memref<1x16x32xf32, #tpu.memory_space<vmem>>, vector<1x1x32xf32>,
    %65 = vector.extract_strided_slice %13 {offsets = [14, 0], sizes = [1, 32], strides = [1, 1]} : vector<16x32xf32> to vector<1x32xf32>
    %66 = vector.extract_strided_slice %13 {offsets = [15, 0], sizes = [1, 32], strides = [1, 1]} : vector<16x32xf32> to vector<1x32xf32>
    %67 = vector.broadcast %1 : f32 to vector<1x32xf32>
    %68 = arith.mulf %67, %65 : vector<1x32xf32>
    %69 = vector.broadcast %3 : f32 to vector<1x32xf32>
    %70 = arith.mulf %69, %66 : vector<1x32xf32>
    %71 = arith.addf %68, %70 : vector<1x32xf32>
    %72 = vector.broadcast %5 : f32 to vector<1x32xf32>
    %73 = arith.addf %71, %72 : vector<1x32xf32>
    %cst_14 = arith.constant 0.000000e+00 : f32
    %74 = vector.broadcast %cst_14 : f32 to vector<1x32xf32>
    %75 = arith.maximumf %73, %74 : vector<1x32xf32>
    %76 = vector.broadcast %7 : f32 to vector<1x32xf32>
    %77 = arith.mulf %76, %65 : vector<1x32xf32>
    %78 = vector.broadcast %11 : f32 to vector<1x32xf32>
    %79 = arith.addf %77, %78 : vector<1x32xf32>
    %cst_15 = arith.constant 0.000000e+00 : f32
    %80 = vector.broadcast %cst_15 : f32 to vector<1x32xf32>
    %81 = arith.maximumf %79, %80 : vector<1x32xf32>
    %82 = arith.addf %75, %81 : vector<1x32xf32>
    %cst_16 = arith.constant 5.000000e-01 : f32
    %83 = vector.broadcast %cst_16 : f32 to vector<1x32xf32>
    %84 = arith.mulf %83, %82 : vector<1x32xf32>
    %85 = arith.addf %84, %66 : vector<1x32xf32>
    %c0_17 = arith.constant 0 : index
    %c15 = arith.constant 15 : index
    %c0_18 = arith.constant 0 : index
    %86 = vector.load %arg4[%c0_17, %c15, %c0_18] : memref<1x16x32xf32, #tpu.memory_space<vmem>>, vector<1x1x32xf32>
    %87 = vector.shape_cast %86 : vector<1x1x32xf32> to vector<1x32xf32>
    %88 = vector.shape_cast %85 : vector<1x32xf32> to vector<1x1x32xf32>
    tpu.vector_store %arg4[%c0_17, %c15, %c0_18], %88 {strides = array<i32>} : memref<1x16x32xf32, #tpu.memory_space<vmem>>, vector<1x1x32xf32>,
    return
  }
  func.func @transform_0(%arg0: i32, %arg1: i32, %arg2: memref<6x4xf32, #tpu.memory_space<smem>>) -> (i32, i32, i32) {
    %c0_i32 = arith.constant 0 : i32
    %c0_i32_0 = arith.constant 0 : i32
    return %arg0, %c0_i32, %arg1 : i32, i32, i32
  }
  func.func @transform_1(%arg0: i32, %arg1: i32, %arg2: memref<6x4xf32, #tpu.memory_space<smem>>) -> (i32, i32, i32) {
    %c0_i32 = arith.constant 0 : i32
    %c0_i32_0 = arith.constant 0 : i32
    return %arg0, %c0_i32, %arg1 : i32, i32, i32
  }
}

</mosaic_0001>

<bundles_post_ra>
// kernel: ms_tconv_short.1
= control target key start
LH: loop header
LB: loop body
LE: loop exit
PB: predicated region body
PF: predicated region fallthrough
CT: control target
= control target key end

     0   :  { %s520_s0 = inlined_call_operand.vmem [shape: f32[6,4], index: 0, kind: input, shape index: {}]   ;;  %s521_s1 = inlined_call_operand.vmem [shape: f32[4,16,32], index: 1, kind: input, shape index: {}]   ;;  %s522_s2 = inlined_call_operand.vmem [shape: f32[4,16,32], index: 2, kind: output, shape index: {}]  }
   0x1   :  { %s7_s11 = sshll.u32 %s520_s0, 4  ;;  %s8_s11 = int_to_ptr.vmem [resolvable:$true] %s7_s11 }
   0x2   :  { %s401_s12 = scalar_lea.vmem %s8_s11, 128  ;;  %p406_p1 = scmp.lt.s32.totalorder %s8_s11, %s8_s11 }
   0x3   :  { %p402_p0 = scmp.ne.s32.totalorder %s8_s11, %s401_s12  ;;  %p407_p2 = scmp.lt.s32.totalorder %s401_s12, %s401_s12 }
   0x5   :  { %p408_p3 = por %p407_p2, %p406_p1 }
   0x7   :  { %p409_p4 = pnand %p408_p3, %p402_p0 }
   0x9   :  { %412 = shalt.err (!%p409_p4)  }
   0xa   :  { %s439_s13 = smov [#allocation3]  }
   0xb   :  { %10 = dma.vmem_to_smem %s8_s11, 128, %s439_s13, [#allocation2] }
   0xc   :  { %425 = dma.done.wait [#allocation2], 128 }
   0xd   :  { %426 = vsyncadd [#allocation2], 4294967168 }
   0xe   :  { %12 = sfence }
   0xf   :  { %s458_s14 = smov 0   ;;  %s460_s15 = smov 0  }
  0x10   :  { %s462_s16 = smov 0  }
  0x11 LB: > { %s30_s0 = sadd.s32 1, %s433_s15  ;;  %p352_p5 = scmp.ge.s32.totalorder %s437_s16, 1  ;;  %s437_s16 = sphi %s462_s16, %s18_s16   ;;  %s433_s15 = sphi %s460_s15, %s524_s15   ;;  %s429_s14 = sphi %s458_s14, %s523_s14  }
  0x12   : > { %p32_p6 = scmp.ge.s32.totalorder %s30_s0, 4  ;;  %p113_p7 = scmp.lt.s32.totalorder %s437_s16, 5 }
  0x14   : > { %s526_s0 = smov (%p32_p6, %s30_s0), 0  ;;  %p114_p8 = pnand %p352_p5, %p113_p7 }
  0x15   : > { %p139_p9 = scmp.lt.s32.totalorder (!%p114_p8), %s429_s14, 3  ;;  %v184_v0 = vlaneseq (!%p114_p8)  ;;  %s155_s17 = sld [smem:[#allocation3 + %s429_s14]] (!%p114_p8)  ;;  %vm226_vm2 = vcmask (!%p114_p8), 261120   ;;  %vm245_vm3 = vcmask (!%p114_p8), 253952   ;;  %vm263_vm4 = vcmask (!%p114_p8), 260102  }
  0x16   : > { %117 = sbr.rel (%p114_p8) target bundleno = 56 (0x38), region = 24  ;;  %s156_s18 = sshra.s32 (!%p114_p8), %s429_s14, 7 }
  0x17   : > { %v185_v1 = vshrl.u32 (!%p114_p8), %v184_v0, 7  ;;  %s366_s20 = sshll.u32 (!%p114_p8), %s156_s18, 7  ;;  %s161_s21 = sand.u32 (!%p114_p8), 127, %s429_s14 }
  0x18   : > { %s367_s23 = sadd.s32 (!%p114_p8), 128, %s366_s20  ;;  %s369_s28 = sadd.s32 (!%p114_p8), 256, %s366_s20 }
  0x19   : > { %s162_s27 = sadd.s32 (!%p114_p8), %s367_s23, %s161_s21  ;;  %vm186_vm0 = vcmp.lt.s32.totalorder (!%p114_p8), %v185_v1, 1  ;;  %s166_s30 = sadd.s32 (!%p114_p8), %s369_s28, %s161_s21  ;;  %vm191_vm1 = vcmp.lt.s32.totalorder (!%p114_p8), %v185_v1, 7 }
  0x1a   : > { %s163_s29 = sld [smem:[#allocation3 + %s162_s27]] (!%p114_p8)  ;;  %s371_s4 = sadd.s32 (!%p114_p8), 384, %s366_s20 }
  0x1b   : > { %s167_s3 = sld [smem:[#allocation3 + %s166_s30]] (!%p114_p8)  ;;  %s170_s5 = sadd.s32 (!%p114_p8), %s371_s4, %s161_s21  ;;  %v194_v7 = vstv (!%p114_p8), %s155_s17 }
  0x1c   : > { %s373_s6 = sadd.s32 (!%p114_p8), 512, %s366_s20  ;;  %s171_s7 = sld [smem:[#allocation3 + %s170_s5]] (!%p114_p8) }
  0x1d   : > { %s476_s19 = scalar_select %p139_p9, %s429_s14, 3 }
  0x1e   : > { %s174_s8 = sadd.s32 %s373_s6, %s161_s21  ;;  %s375_s10 = sadd.s32 640, %s366_s20 }
  0x1f   : > { %s364_s22 = sshll.u32 %s476_s19, 4  ;;  %s175_s9 = sld [smem:[#allocation3 + %s174_s8]] }
  0x20   : > { %s146_s26 = scalar_lea.vmem %s521_s1, %s364_s22  ;;  %s178_s11 = sadd.s32 %s375_s10, %s161_s21  ;;  %v197_v13 = vstv %s163_s29 }
  0x21   : > { %v484_v2 = vld [vmem:[%s146_s26] sm:$0xff]  ;;  %v486_v3 = vld [vmem:[%s146_s26 + $0x8] sm:$0xff]  ;;  %s179_s12 = sld [smem:[#allocation3 + %s178_s11]]  ;;  %v202_v18 = vstv %s167_s3  ;;  %s154_s17 = scalar_lea.vmem %s522_s2, %s364_s22 }
  0x22   : > { %v182_v4 = vrot.slane %v484_v2, 7  ;;  %v183_v5 = vrot.slane %v486_v3, 7  ;;  %v189_v9 = vrot.slane %v484_v2, 1  ;;  %v492_v10 = vrot.slane %v486_v3, 1 }
  0x23   : > { %v198_v14 = vmul.f32 %v197_v13, %v484_v2  ;;  %v247_v15 = vmul.f32 %v194_v7, %v486_v3  ;;  %v199_v16 = vmul.f32 %v197_v13, %v486_v3  ;;  %v229_v20 = vmul.f32 %v194_v7, %v484_v2 }
  0x24   : > { %v188_v6 = vsel %vm186_vm0, %v183_v5, %v182_v4  ;;  %v187_v8 = vsel %vm186_vm0, %v182_v4, %v183_v5  ;;  %v192_v17 = vsel %vm191_vm1, %v189_v9, %v492_v10  ;;  %v193_v19 = vsel %vm191_vm1, %v492_v10, %v189_v9 }
  0x25   : > { %v195_v11 = vmul.f32 %v194_v7, %v188_v6  ;;  %v196_v12 = vmul.f32 %v194_v7, %v187_v8  ;;  %v207_v22 = vstv %s171_s7  ;;  %v231_v23 = vrot.slane %v198_v14, 1 }
  0x26   : > { %v208_v25 = vmul.f32 %v207_v22, %v188_v6  ;;  %v210_v26 = vstv %s175_s9  ;;  %v209_v27 = vmul.f32 %v207_v22, %v187_v8  ;;  %v249_v28 = vrot.slane %v199_v16, 1 }
  0x27   : > { %v200_v21 = vadd.f32 %v198_v14, %v195_v11  ;;  %v201_v24 = vadd.f32 %v199_v16, %v196_v12  ;;  %v211_v30 = vmul.f32 %v210_v26, %v192_v17  ;;  %v212_v32 = vmul.f32 %v210_v26, %v193_v19 }
  0x28   : > { %v215_v33 = vstv %s179_s12  ;;  %v233_v34 = vadd.f32 %v231_v23, %v229_v20  ;;  %v236_v35 = vmul.f32 %v210_v26, %v484_v2  ;;  %v251_v36 = vadd.f32 %v249_v28, %v247_v15 }
  0x29   : > { %v203_v29 = vadd.f32 %v202_v18, %v200_v21  ;;  %v204_v31 = vadd.f32 %v202_v18, %v201_v24  ;;  %v213_v37 = vadd.f32 %v211_v30, %v208_v25  ;;  %v214_v38 = vadd.f32 %v212_v32, %v209_v27 }
  0x2a   : > { %v234_v39 = vadd.f32 %v233_v34, %v202_v18  ;;  %v237_v40 = vadd.f32 %v236_v35, %v215_v33  ;;  %v252_v41 = vadd.f32 %v251_v36, %v202_v18  ;;  %v254_v42 = vmul.f32 %v207_v22, %v486_v3 }
  0x2b   : > { %v205_v43 = vmax.f32 %v203_v29, 0.0  ;;  %v216_v44 = vadd.f32 %v215_v33, %v213_v37  ;;  %v206_v45 = vmax.f32 %v204_v31, 0.0  ;;  %v217_v46 = vadd.f32 %v215_v33, %v214_v38 }
  0x2c   : > { %v235_v47 = vmax.f32 %v234_v39, 0.0  ;;  %v238_v48 = vmax.f32 %v237_v40, 0.0  ;;  %v253_v49 = vmax.f32 %v252_v41, 0.0  ;;  %v255_v50 = vadd.f32 %v254_v42, %v215_v33 }
  0x2d   : > { %v218_v51 = vmax.f32 %v216_v44, 0.0  ;;  %v219_v52 = vmax.f32 %v217_v46, 0.0 }
  0x2e   : > { %v240_v53 = vrot.slane %v238_v48, 1  ;;  %v256_v54 = vmax.f32 %v255_v50, 0.0 }
  0x2f   : > { %v220_v55 = vadd.f32 %v218_v51, %v205_v43  ;;  %v221_v56 = vadd.f32 %v219_v52, %v206_v45 }
  0x30   : > { %v242_v57 = vadd.f32 %v240_v53, %v235_v47  ;;  %v257_v58 = vadd.f32 %v256_v54, %v253_v49 }
  0x31   : > { %v222_v59 = vmul.f32 0.5, %v220_v55  ;;  %v223_v60 = vmul.f32 0.5, %v221_v56 }
  0x32   : > { %v243_v61 = vmul.f32 0.5, %v242_v57  ;;  %v258_v62 = vmul.f32 0.5, %v257_v58 }
  0x33   : > { %v224_v63 = vadd.f32 %v222_v59, %v484_v2  ;;  %v225_v0 = vadd.f32 %v223_v60, %v486_v3 }
  0x34   : > { %v244_v1 = vadd.f32 %v243_v61, %v484_v2  ;;  %v262_v4 = vadd.f32 %v258_v62, %v492_v10 }
  0x35   : > { %227 = vst.msk [vmem:[%s154_s17] sm:$0xff] %vm226_vm2, %v224_v63  ;;  %228 = vst.msk [vmem:[%s154_s17 + $0x8] sm:$0xff] %vm226_vm2, %v225_v0 }
  0x36   : > { %246 = vst.msk [vmem:[%s154_s17] sm:$0x1] %vm245_vm3, %v244_v1 }
  0x37   : > { %264 = vst.msk [vmem:[%s154_s17 + $0x9] sm:$0x40] %vm263_vm4, %v262_v4 }
  0x38 PF: > { %s18_s16 = sadd.s32 1, %s437_s16   ;;  %s523_s14 = smov %s433_s15 }
  0x39   : > { %p15_p10 = scmp.ge.s32.totalorder %s18_s16, 6   ;;  %s524_s15 = smov %s526_s0 }
  0x3b   :  { %17 = sbr.rel (!%p15_p10) target bundleno = 17 (0x11), region = 54 }

</bundles_post_ra>
